<compile_context>
chip_gen: v5e
topology: v5e:2x2
jax: 0.10.0
libtpu: 0.0.40
codegen_flags: <defaults>
</compile_context>

<pallas_src>
import jax
import jax.numpy as jnp
from jax.experimental import pallas as pl
from jax.experimental.pallas import tpu as pltpu

K1, K2, K3 = 0.63576, 1.8732, 1.48695
PAD_W, PAD_LOG_SIGMA = 1.0, 0.0     # benign pad values; contribution removed analytically
NUM_CORE_SPLITS = 2                 # leading "parallel" grid axis (uses both v7x TCs)


def _kl_el(w, log_sigma):
    """Per-element KL integrand (tanh form of sigmoid: 1 EUP op instead of exp+recip)."""
    la = jnp.clip(2.0 * (log_sigma - jnp.log(1e-16 + jnp.abs(w))), -10.0, 10.0)
    sig = 0.5 * jnp.tanh(0.5 * (K2 + K3 * la)) + 0.5
    return K1 * sig - 0.5 * jnp.log1p(jnp.exp(-la)) - K1


def sgvlb_kernel(scalars_ref,     # SMEM (3,) f32: [train_size, kl_weight, pad_correction]
                 logits_ref,      # VMEM [N, C]      (resident across the grid)
                 targets_ref,     # VMEM [N, 1] i32  (resident)
                 w_ref,           # VMEM [tile_r, 128]  (streamed per grid step)
                 log_sigma_ref,   # VMEM [tile_r, 128]  (streamed per grid step)
                 out_ref,         # VMEM [1, 8, 128]    (one row per core split)
                 ce_ref,          # SMEM (1,) f32 scratch
                 kl_acc_ref):     # VMEM (1, 128) f32 scratch: lane-wise KL partials
    ci = pl.program_id(0)               # core-split index ("parallel")
    i = pl.program_id(1)                # KL tile index   ("arbitrary")
    nsteps = pl.num_programs(1)

    # ---- per-core-split init ----
    @pl.when(i == 0)
    def _init():
        ce_ref[0] = jnp.float32(0.0)
        kl_acc_ref[...] = jnp.zeros_like(kl_acc_ref)

    # ---- cross entropy (mean over batch), computed once on core split 0 ----
    @pl.when((ci == 0) & (i == 0))
    def _cross_entropy():
        logits = logits_ref[...].astype(jnp.float32)
        n, c = logits.shape
        z = logits - jnp.max(logits, axis=-1, keepdims=True)
        logp = z - jnp.log(jnp.sum(jnp.exp(z), axis=-1, keepdims=True))   # log-softmax
        cls = jax.lax.broadcasted_iota(jnp.int32, (n, c), 1)
        # NOTE: out-of-range targets contribute 0 (no PyTorch ignore_index semantics).
        picked = jnp.where(cls == targets_ref[...], logp, 0.0)
        ce_ref[0] = -jnp.sum(picked) / jnp.float32(n)                     # mean NLL

    # ---- KL tile: 4 EUP ops/element, no iota/mask in the steady-state loop ----
    kl_el = _kl_el(w_ref[...].astype(jnp.float32),
                   log_sigma_ref[...].astype(jnp.float32))
    # sublane-reduce into lane partials; cross-lane reduce deferred to the final step
    kl_acc_ref[...] += jnp.sum(kl_el, axis=0, keepdims=True)

    # ---- per-core-split finalize ----
    @pl.when(i == nsteps - 1)
    def _finalize():
        kl_core = -jnp.sum(kl_acc_ref[...])
        # remove the analytically-known contribution of the padding (once, on last split)
        kl_core += jnp.where(ci == pl.num_programs(0) - 1, scalars_ref[2], 0.0)
        total = ce_ref[0] * scalars_ref[0] + scalars_ref[1] * kl_core
        out_ref[...] = jnp.full(out_ref.shape, total, dtype=out_ref.dtype)


def sgvlb_pallas(logits, targets, w_slab, log_sigma_slab, tile_r, pad_correction,
                 train_size, kl_weight=1.0, ncores=NUM_CORE_SPLITS):
    """SGVLB loss. w_slab/log_sigma_slab come from pack_vdo_params (packed ONCE at init)."""
    n, c = logits.shape
    rows, lanes = w_slab.shape
    ntiles = rows // tile_r
    assert ntiles * tile_r == rows and ntiles % ncores == 0
    steps = ntiles // ncores

    scalars = jnp.array([train_size, kl_weight, pad_correction], dtype=jnp.float32)
    tgt = targets.astype(jnp.int32).reshape(n, 1)

    smem = pl.BlockSpec(memory_space=pltpu.MemorySpace.SMEM)
    out = pl.pallas_call(
        sgvlb_kernel,
        out_shape=jax.ShapeDtypeStruct((ncores, 8, 128), jnp.float32),
        grid=(ncores, steps),
        in_specs=[
            smem,                                                            # scalars
            pl.BlockSpec((n, c), lambda ci, i: (0, 0)),                      # logits (resident)
            pl.BlockSpec((n, 1), lambda ci, i: (0, 0)),                      # targets (resident)
            pl.BlockSpec((tile_r, lanes), lambda ci, i: (ci * steps + i, 0)),  # W slab
            pl.BlockSpec((tile_r, lanes), lambda ci, i: (ci * steps + i, 0)),  # log_sigma slab
        ],
        out_specs=pl.BlockSpec((1, 8, 128), lambda ci, i: (ci, 0, 0)),
        scratch_shapes=[pltpu.SMEM((1,), jnp.float32),        # ce
                        pltpu.VMEM((1, 128), jnp.float32)],   # kl lane partials
        compiler_params=pltpu.CompilerParams(
            dimension_semantics=("parallel", "arbitrary"),
            vmem_limit_bytes=32 * 1024 * 1024),
    )(scalars, logits, tgt, w_slab, log_sigma_slab)
    # row ci holds: (ce*train_size if ci==0 else 0) + kl_weight * kl_partial_ci
    return jnp.sum(out[:, 0, 0])


def pack_vdo_params(param_list, lanes=128, max_tile_rows=4096,
                    ncores=NUM_CORE_SPLITS, stream_dtype=jnp.float32):
    """Pack (W, log_sigma) pairs of all VDO layers into lane-dense [rows, 128] slabs.

    Call ONCE at init (or store the parameters permanently in this layout and view them
    per-layer); re-packing per training step re-reads+writes every VDO param in HBM.
    stream_dtype=jnp.bfloat16 halves HBM traffic (useful on v5e); compute stays f32.
    Returns (w_slab, log_sigma_slab, tile_r, pad_correction).
    """
    w_flat = jnp.concatenate([jnp.ravel(w) for (w, _) in param_list]).astype(stream_dtype)
    s_flat = jnp.concatenate([jnp.ravel(s) for (_, s) in param_list]).astype(stream_dtype)
    n = int(w_flat.shape[0])

    rows_min = -(-max(n, 1) // lanes)
    rows_min = max(8, -(-rows_min // 8) * 8)              # sublane multiple
    ntiles = max(ncores, -(-rows_min // max_tile_rows))
    ntiles = -(-ntiles // ncores) * ncores                # divisible by the core splits
    tile_rows = -(-rows_min // ntiles)                    # ceil(rows_min / ntiles)
    tile_r = -(-tile_rows // 8) * 8                       # round up to sublane multiple
    rows = ntiles * tile_r

    pad = rows * lanes - n
    w_pad = jnp.concatenate([w_flat, jnp.full((pad,), PAD_W, stream_dtype)])
    s_pad = jnp.concatenate([s_flat, jnp.full((pad,), PAD_LOG_SIGMA, stream_dtype)])

    # analytically-known pad contribution, removed in the kernel's final combine
    kl_pad = _kl_el(jnp.float32(PAD_W), jnp.float32(PAD_LOG_SIGMA))
    pad_correction = float(pad) * float(kl_pad)

    return (w_pad.reshape(rows, lanes), s_pad.reshape(rows, lanes), tile_r, pad_correction)


def _reference(logits, targets, param_list, train_size, kl_weight=1.0):
    logp = jax.nn.log_softmax(logits.astype(jnp.float32), axis=-1)
    ce = -jnp.mean(logp[jnp.arange(logits.shape[0]), targets])
    kl = 0.0
    for w, log_sigma in param_list:
        la = jnp.clip(2.0 * log_sigma - 2.0 * jnp.log(1e-16 + jnp.abs(w)), -10.0, 10.0)
        kle = K1 * jax.nn.sigmoid(K2 + K3 * la) - 0.5 * jnp.log1p(jnp.exp(-la)) - K1
        kl = kl - jnp.sum(kle)
    return ce * train_size + kl_weight * kl


if __name__ == "__main__":
    key = jax.random.PRNGKey(0)
    k_logits, k_tgt, k_w1, k_s1, k_w2, k_s2 = jax.random.split(key, 6)

    N, C = 8, 10                      # batch, num classes
    train_size = 60000.0
    kl_weight = 1.0

    logits = jax.random.normal(k_logits, (N, C), dtype=jnp.float32)
    targets = jax.random.randint(k_tgt, (N,), 0, C)

    # two synthetic LinearVDO layers: (in=32 -> 64) and (64 -> 10)
    vdo_params = [
        (0.1 * jax.random.normal(k_w1, (64, 32), jnp.float32),
         -3.0 + 0.1 * jax.random.normal(k_s1, (64, 32), jnp.float32)),
        (0.1 * jax.random.normal(k_w2, (10, 64), jnp.float32),
         -3.0 + 0.1 * jax.random.normal(k_s2, (10, 64), jnp.float32)),
    ]

    # Pack ONCE at init. max_tile_rows is tiny here only so the toy example exercises a
    # multi-step grid on both core splits; use the default (4096) for real models.
    w_slab, log_sigma_slab, tile_r, pad_corr = pack_vdo_params(vdo_params, max_tile_rows=8)

    loss = sgvlb_pallas(logits, targets, w_slab, log_sigma_slab, tile_r, pad_corr,
                        train_size, kl_weight)
    loss = jax.block_until_ready(loss)

    ref = _reference(logits, targets, vdo_params, train_size, kl_weight)
    assert jnp.allclose(loss, ref, rtol=1e-4, atol=1e-2), (loss, ref)

    print("KERNEL_OK")
</pallas_src>

<mosaic_0001>
module attributes {stable_mosaic.version = 11 : i64} {
  func.func @sgvlb_kernel(%arg0: i32, %arg1: i32, %arg2: memref<3xf32, #tpu.memory_space<smem>>, %arg3: memref<8x10xf32, #tpu.memory_space<vmem>>, %arg4: memref<8x1xi32, #tpu.memory_space<vmem>>, %arg5: memref<8x128xf32, #tpu.memory_space<vmem>>, %arg6: memref<8x128xf32, #tpu.memory_space<vmem>>, %arg7: memref<1x8x128xf32, #tpu.memory_space<vmem>>, %arg8: memref<1xf32, #tpu.memory_space<smem>>, %arg9: memref<1x128xf32, #tpu.memory_space<vmem>>) attributes {dimension_semantics = [#tpu.dimension_semantics<parallel>, #tpu.dimension_semantics<arbitrary>], iteration_bounds = array<i64: 2, 2>, scalar_prefetch = 0 : i64, scratch_operands = 2 : i64, tpu.core_type = #tpu.core_type<tc>, window_params = [{transform_indices = @transform_0, window_bounds = array<i64: 3>}, {pipeline_mode = #tpu.pipeline_mode<synchronous>, transform_indices = @transform_1, window_bounds = array<i64: 8, 10>}, {pipeline_mode = #tpu.pipeline_mode<synchronous>, transform_indices = @transform_2, window_bounds = array<i64: 8, 1>}, {transform_indices = @transform_3, window_bounds = array<i64: 8, 128>}, {transform_indices = @transform_4, window_bounds = array<i64: 8, 128>}, {transform_indices = @transform_5, window_bounds = array<i64: 1, 8, 128>}]} {
    %c0_i32 = arith.constant 0 : i32
    %0 = arith.cmpi eq, %arg1, %c0_i32 : i32
    %1 = arith.extui %0 : i1 to i32
    %c0_i32_0 = arith.constant 0 : i32
    %2 = arith.cmpi ne, %1, %c0_i32_0 : i32
    scf.if %2 {
      %cst_25 = arith.constant 0.000000e+00 : f32
      %c0_26 = arith.constant 0 : index
      %51 = memref.load %arg8[%c0_26] : memref<1xf32, #tpu.memory_space<smem>>
      memref.store %cst_25, %arg8[%c0_26] : memref<1xf32, #tpu.memory_space<smem>>
      %cst_27 = arith.constant 0.000000e+00 : f32
      %52 = vector.broadcast %cst_27 : f32 to vector<1x128xf32>
      %c0_28 = arith.constant 0 : index
      %c0_29 = arith.constant 0 : index
      %53 = vector.load %arg9[%c0_28, %c0_29] : memref<1x128xf32, #tpu.memory_space<vmem>>, vector<1x128xf32>
      tpu.vector_store %arg9[%c0_28, %c0_29], %52 {strides = array<i32>} : memref<1x128xf32, #tpu.memory_space<vmem>>, vector<1x128xf32>,
    } else {
    }
    %c0_i32_1 = arith.constant 0 : i32
    %3 = arith.cmpi eq, %arg0, %c0_i32_1 : i32
    %c0_i32_2 = arith.constant 0 : i32
    %4 = arith.cmpi eq, %arg1, %c0_i32_2 : i32
    %5 = arith.andi %3, %4 : i1
    %6 = arith.extui %5 : i1 to i32
    %c0_i32_3 = arith.constant 0 : i32
    %7 = arith.cmpi ne, %6, %c0_i32_3 : i32
    scf.if %7 {
      %c0_25 = arith.constant 0 : index
      %c0_26 = arith.constant 0 : index
      %51 = vector.load %arg3[%c0_25, %c0_26] : memref<8x10xf32, #tpu.memory_space<vmem>>, vector<8x10xf32>
      %cst_27 = arith.constant dense<0xFF800000> : vector<8xf32>
      %52 = vector.multi_reduction <maximumf>, %51, %cst_27 [1] : vector<8x10xf32> to vector<8xf32>
      %53 = vector.shape_cast %52 : vector<8xf32> to vector<8x1xf32>
      %54 = vector.broadcast %53 : vector<8x1xf32> to vector<8x10xf32>
      %55 = arith.subf %51, %54 : vector<8x10xf32>
      %56 = math.exp %55 : vector<8x10xf32>
      %cst_28 = arith.constant dense<0.000000e+00> : vector<8xf32>
      %57 = vector.multi_reduction <add>, %56, %cst_28 [1] : vector<8x10xf32> to vector<8xf32>
      %58 = vector.shape_cast %57 : vector<8xf32> to vector<8x1xf32>
      %59 = math.log %58 : vector<8x1xf32>
      %60 = vector.broadcast %59 : vector<8x1xf32> to vector<8x10xf32>
      %61 = arith.subf %55, %60 : vector<8x10xf32>
      %62 = tpu.iota {dimensions = array<i32: 1>} : vector<8x10xi32>
      %c0_29 = arith.constant 0 : index
      %c0_30 = arith.constant 0 : index
      %63 = vector.load %arg4[%c0_29, %c0_30] : memref<8x1xi32, #tpu.memory_space<vmem>>, vector<8x1xi32>
      %64 = vector.broadcast %63 : vector<8x1xi32> to vector<8x10xi32>
      %65 = arith.cmpi eq, %62, %64 : vector<8x10xi32>
      %cst_31 = arith.constant 0.000000e+00 : f32
      %66 = vector.broadcast %cst_31 : f32 to vector<8x10xf32>
      %67 = arith.select %65, %61, %66 : vector<8x10xi1>, vector<8x10xf32>
      %68 = vector.shape_cast %67 : vector<8x10xf32> to vector<1x8x10xf32>
      %cst_32 = arith.constant dense<0.000000e+00> : vector<1xf32>
      %69 = vector.multi_reduction <add>, %68, %cst_32 [1, 2] : vector<1x8x10xf32> to vector<1xf32>
      %70 = vector.shape_cast %69 : vector<1xf32> to vector<1x1x1xf32>
      %71 = vector.extract %70[0, 0, 0] : f32 from vector<1x1x1xf32>
      %cst_33 = arith.constant 0.000000e+00 : f32
      %72 = arith.subf %cst_33, %71 : f32
      %cst_34 = arith.constant 8.000000e+00 : f32
      %73 = arith.divf %72, %cst_34 : f32
      %c0_35 = arith.constant 0 : index
      %74 = memref.load %arg8[%c0_35] : memref<1xf32, #tpu.memory_space<smem>>
      memref.store %73, %arg8[%c0_35] : memref<1xf32, #tpu.memory_space<smem>>
    } else {
    }
    %c0 = arith.constant 0 : index
    %c0_4 = arith.constant 0 : index
    %8 = vector.load %arg5[%c0, %c0_4] : memref<8x128xf32, #tpu.memory_space<vmem>>, vector<8x128xf32>
    %c0_5 = arith.constant 0 : index
    %c0_6 = arith.constant 0 : index
    %9 = vector.load %arg6[%c0_5, %c0_6] : memref<8x128xf32, #tpu.memory_space<vmem>>, vector<8x128xf32>
    %10 = math.absf %8 : vector<8x128xf32>
    %cst = arith.constant 1.000000e-16 : f32
    %11 = vector.broadcast %cst : f32 to vector<8x128xf32>
    %12 = arith.addf %11, %10 : vector<8x128xf32>
    %13 = math.log %12 : vector<8x128xf32>
    %14 = arith.subf %9, %13 : vector<8x128xf32>
    %cst_7 = arith.constant 2.000000e+00 : f32
    %15 = vector.broadcast %cst_7 : f32 to vector<8x128xf32>
    %16 = arith.mulf %15, %14 : vector<8x128xf32>
    %cst_8 = arith.constant -1.000000e+01 : f32
    %cst_9 = arith.constant 1.000000e+01 : f32
    %17 = vector.broadcast %cst_8 : f32 to vector<8x128xf32>
    %18 = arith.maximumf %17, %16 : vector<8x128xf32>
    %19 = vector.broadcast %cst_9 : f32 to vector<8x128xf32>
    %20 = arith.minimumf %19, %18 : vector<8x128xf32>
    %cst_10 = arith.constant 1.486950e+00 : f32
    %21 = vector.broadcast %cst_10 : f32 to vector<8x128xf32>
    %22 = arith.mulf %21, %20 : vector<8x128xf32>
    %cst_11 = arith.constant 1.873200e+00 : f32
    %23 = vector.broadcast %cst_11 : f32 to vector<8x128xf32>
    %24 = arith.addf %23, %22 : vector<8x128xf32>
    %cst_12 = arith.constant 5.000000e-01 : f32
    %25 = vector.broadcast %cst_12 : f32 to vector<8x128xf32>
    %26 = arith.mulf %25, %24 : vector<8x128xf32>
    %27 = math.tanh %26 : vector<8x128xf32>
    %cst_13 = arith.constant 5.000000e-01 : f32
    %28 = vector.broadcast %cst_13 : f32 to vector<8x128xf32>
    %29 = arith.mulf %28, %27 : vector<8x128xf32>
    %cst_14 = arith.constant 5.000000e-01 : f32
    %30 = vector.broadcast %cst_14 : f32 to vector<8x128xf32>
    %31 = arith.addf %29, %30 : vector<8x128xf32>
    %cst_15 = arith.constant 6.357600e-01 : f32
    %32 = vector.broadcast %cst_15 : f32 to vector<8x128xf32>
    %33 = arith.mulf %32, %31 : vector<8x128xf32>
    %cst_16 = arith.constant 0.000000e+00 : f32
    %34 = vector.broadcast %cst_16 : f32 to vector<8x128xf32>
    %35 = arith.subf %34, %20 : vector<8x128xf32>
    %36 = math.exp %35 : vector<8x128xf32>
    %37 = math.log1p %36 : vector<8x128xf32>
    %cst_17 = arith.constant 5.000000e-01 : f32
    %38 = vector.broadcast %cst_17 : f32 to vector<8x128xf32>
    %39 = arith.mulf %38, %37 : vector<8x128xf32>
    %40 = arith.subf %33, %39 : vector<8x128xf32>
    %cst_18 = arith.constant 6.357600e-01 : f32
    %41 = vector.broadcast %cst_18 : f32 to vector<8x128xf32>
    %42 = arith.subf %40, %41 : vector<8x128xf32>
    %c0_19 = arith.constant 0 : index
    %c0_20 = arith.constant 0 : index
    %43 = vector.load %arg9[%c0_19, %c0_20] : memref<1x128xf32, #tpu.memory_space<vmem>>, vector<1x128xf32>
    %cst_21 = arith.constant dense<0.000000e+00> : vector<128xf32>
    %44 = vector.multi_reduction <add>, %42, %cst_21 [0] : vector<8x128xf32> to vector<128xf32>
    %45 = vector.shape_cast %44 : vector<128xf32> to vector<1x128xf32>
    %46 = arith.addf %43, %45 : vector<1x128xf32>
    %c0_22 = arith.constant 0 : index
    %c0_23 = arith.constant 0 : index
    %47 = vector.load %arg9[%c0_22, %c0_23] : memref<1x128xf32, #tpu.memory_space<vmem>>, vector<1x128xf32>
    tpu.vector_store %arg9[%c0_22, %c0_23], %46 {strides = array<i32>} : memref<1x128xf32, #tpu.memory_space<vmem>>, vector<1x128xf32>,
    %c1_i32 = arith.constant 1 : i32
    %48 = arith.cmpi eq, %arg1, %c1_i32 : i32
    %49 = arith.extui %48 : i1 to i32
    %c0_i32_24 = arith.constant 0 : i32
    %50 = arith.cmpi ne, %49, %c0_i32_24 : i32
    scf.if %50 {
      %c0_25 = arith.constant 0 : index
      %c0_26 = arith.constant 0 : index
      %51 = vector.load %arg9[%c0_25, %c0_26] : memref<1x128xf32, #tpu.memory_space<vmem>>, vector<1x128xf32>
      %52 = vector.shape_cast %51 : vector<1x128xf32> to vector<1x1x128xf32>
      %cst_27 = arith.constant dense<0.000000e+00> : vector<1xf32>
      %53 = vector.multi_reduction <add>, %52, %cst_27 [1, 2] : vector<1x1x128xf32> to vector<1xf32>
      %54 = vector.shape_cast %53 : vector<1xf32> to vector<1x1x1xf32>
      %55 = vector.extract %54[0, 0, 0] : f32 from vector<1x1x1xf32>
      %cst_28 = arith.constant 0.000000e+00 : f32
      %56 = arith.subf %cst_28, %55 : f32
      %c1_i32_29 = arith.constant 1 : i32
      %57 = arith.cmpi eq, %arg0, %c1_i32_29 : i32
      %c2 = arith.constant 2 : index
      %58 = memref.load %arg2[%c2] : memref<3xf32, #tpu.memory_space<smem>>
      %cst_30 = arith.constant 0.000000e+00 : f32
      %59 = arith.select %57, %58, %cst_30 : f32
      %60 = arith.addf %56, %59 : f32
      %c0_31 = arith.constant 0 : index
      %61 = memref.load %arg8[%c0_31] : memref<1xf32, #tpu.memory_space<smem>>
      %c0_32 = arith.constant 0 : index
      %62 = memref.load %arg2[%c0_32] : memref<3xf32, #tpu.memory_space<smem>>
      %63 = arith.mulf %61, %62 : f32
      %c1 = arith.constant 1 : index
      %64 = memref.load %arg2[%c1] : memref<3xf32, #tpu.memory_space<smem>>
      %65 = arith.mulf %64, %60 : f32
      %66 = arith.addf %63, %65 : f32
      %67 = vector.broadcast %66 : f32 to vector<1x8x128xf32>
      %c0_33 = arith.constant 0 : index
      %c0_34 = arith.constant 0 : index
      %c0_35 = arith.constant 0 : index
      %68 = vector.load %arg7[%c0_33, %c0_34, %c0_35] : memref<1x8x128xf32, #tpu.memory_space<vmem>>, vector<1x8x128xf32>
      tpu.vector_store %arg7[%c0_33, %c0_34, %c0_35], %67 {strides = array<i32>} : memref<1x8x128xf32, #tpu.memory_space<vmem>>, vector<1x8x128xf32>,
    } else {
    }
    return
  }
  func.func @transform_0(%arg0: i32, %arg1: i32) -> i32 {
    %c0_i32 = arith.constant 0 : i32
    %c0_i32_0 = arith.constant 0 : i32
    return %c0_i32 : i32
  }
  func.func @transform_1(%arg0: i32, %arg1: i32) -> (i32, i32) {
    %c0_i32 = arith.constant 0 : i32
    %c0_i32_0 = arith.constant 0 : i32
    %c0_i32_1 = arith.constant 0 : i32
    return %c0_i32, %c0_i32_0 : i32, i32
  }
  func.func @transform_2(%arg0: i32, %arg1: i32) -> (i32, i32) {
    %c0_i32 = arith.constant 0 : i32
    %c0_i32_0 = arith.constant 0 : i32
    %c0_i32_1 = arith.constant 0 : i32
    return %c0_i32, %c0_i32_0 : i32, i32
  }
  func.func @transform_3(%arg0: i32, %arg1: i32) -> (i32, i32) {
    %c2_i32 = arith.constant 2 : i32
    %0 = arith.muli %arg0, %c2_i32 : i32
    %1 = arith.addi %0, %arg1 : i32
    %c0_i32 = arith.constant 0 : i32
    %c0_i32_0 = arith.constant 0 : i32
    return %1, %c0_i32 : i32, i32
  }
  func.func @transform_4(%arg0: i32, %arg1: i32) -> (i32, i32) {
    %c2_i32 = arith.constant 2 : i32
    %0 = arith.muli %arg0, %c2_i32 : i32
    %1 = arith.addi %0, %arg1 : i32
    %c0_i32 = arith.constant 0 : i32
    %c0_i32_0 = arith.constant 0 : i32
    return %1, %c0_i32 : i32, i32
  }
  func.func @transform_5(%arg0: i32, %arg1: i32) -> (i32, i32, i32) {
    %c0_i32 = arith.constant 0 : i32
    %c0_i32_0 = arith.constant 0 : i32
    %c0_i32_1 = arith.constant 0 : i32
    return %arg0, %c0_i32, %c0_i32_0 : i32, i32, i32
  }
}

</mosaic_0001>

<bundles_post_ra>
// kernel: tpu_custom_call.1
= control target key start
LH: loop header
LB: loop body
LE: loop exit
PB: predicated region body
PF: predicated region fallthrough
CT: control target
= control target key end

     0   :  { %s1237_s0 = inlined_call_operand.vmem [shape: f32[3], index: 0, kind: input, shape index: {}]   ;;  %s1238_s1 = inlined_call_operand.vmem [shape: f32[8,10], index: 1, kind: input, shape index: {}]   ;;  %s1239_s2 = inlined_call_operand.vmem [shape: s32[8,1], index: 2, kind: input, shape index: {}]   ;;  %s1240_s3 = inlined_call_operand.hbm [shape: f32[32,128], index: 3, kind: input, shape index: {}]   ;;  %s1241_s4 = inlined_call_operand.hbm [shape: f32[32,128], index: 4, kind: input, shape index: {}]   ;;  %s1242_s5 = inlined_call_operand.hbm [shape: f32[2,8,128], index: 5, kind: output, shape index: {}]  }
   0x1   :  { %1252 = sst [smem:[#allocation23_spill]] %s1237_s0 }
   0x2   :  { %1253 = sst [smem:[#allocation24_spill]] %s1238_s1 }
   0x3   :  { %1254 = sst [smem:[#allocation25_spill]] %s1239_s2 }
   0x4   :  { %1255 = sst [smem:[#allocation26_spill]] %s1242_s5 }
   0x5   :  { %10 = vsyncpa [#allocation7], 0 }
   0x6   :  { %11 = vsyncpa [#allocation5], 0 }
   0x7   :  { %13 = vsyncpa [#allocation5 + $0x1], 0 }
   0x8   :  { %14 = vsyncpa [#allocation10], 0 }
   0x9   :  { %16 = vsyncpa [#allocation10 + $0x1], 0 }
   0xa   :  { %17 = vsyncpa [#allocation6], 0 }
   0xb   :  { %19 = vsyncpa [#allocation6 + $0x1], 0  ;;  %s1001_s18 = smov 0   ;;  %s1003_s19 = smov 0  }
   0xc   :  { %s1005_s20 = smov 0   ;;  %s1007_s21 = smov 0  }
   0xd   :  { %s1009_s22 = smov 0   ;;  %s1011_s23 = smov 0  }
   0xe   :  { %s1013_s24 = smov 0   ;;  %s1015_s25 = smov 0  }
   0xf   :  { %s1017_s26 = smov 0   ;;  %s1019_s27 = smov 0  }
  0x10   :  { %s1021_s28 = smov 0  }
  0x11 LB: > { %1256 = sst [smem:[#allocation16_spill]] %s924_s18  ;;  %s585_s29 = sadd.s32 4294967295, %s964_s28   ;;  %s964_s28 = sphi %s1021_s28, %s25_s28   ;;  %s960_s27 = sphi %s1019_s27, %s1294_s27   ;;  %s956_s26 = sphi %s1017_s26, %s1293_s26   ;;  %s952_s25 = sphi %s1015_s25, %s1292_s25   ;;  %s948_s24 = sphi %s1013_s24, %s1284_s24   ;;  %s944_s23 = sphi %s1011_s23, %s1291_s23   ;;  %s940_s22 = sphi %s1009_s22, %s1290_s22   ;;  %s936_s21 = sphi %s1007_s21, %s1289_s21   ;;  %s932_s20 = sphi %s1005_s20, %s1288_s20   ;;  %s928_s19 = sphi %s1003_s19, %s1287_s19   ;;  %s924_s18 = sphi %s1001_s18, %s1286_s18  }
  0x12   : > { %1257 = sst [smem:[#allocation17_spill]] %s948_s24  ;;  %s586_s30 = sadd.s32 4294967294, %s964_s28  }
  0x13   : > { %1258 = sst [smem:[#allocation18_spill]] %s952_s25  ;;  %p124_p0 = scmp.ne.s32.totalorder %s940_s22, %s936_s21 }
  0x14   : > { %1259 = sst [smem:[#allocation19_spill]] %s956_s26  ;;  %p1057_p1 = scmp.eq.s32.totalorder %s585_s29, 0 }
  0x15   : > { %p177_p2 = scmp.ne.s32.totalorder %s932_s20, %s928_s19  ;;  %p178_p4 = scmp.eq.s32.totalorder %s585_s29, 3 }
  0x16   : > { %p1066_p3 = por %p1057_p1, %p124_p0  ;;  %p183_p5 = scmp.ne.s32.totalorder %s928_s19, %s924_s18 }
  0x17   : > { %p184_p6 = scmp.eq.s32.totalorder %s586_s30, 3  ;;  %p1072_p7 = por %p178_p4, %p177_p2 }
  0x18   : > { %p591_p8 = scmp.ge.s32.totalorder %s964_s28, 1  ;;  %p191_p10 = scmp.lt.s32.totalorder %s964_s28, 5 }
  0x19   : > { %s1262_s9 = scalar_select %p1072_p7, 1, 0 }
  0x1a   : > { %p1077_p9 = por %p184_p6, %p183_p5  ;;  %s1266_s0 = sld [smem:[#allocation23_spill]] }
  0x1b   : > { %1263 = sst [smem:[#allocation20_spill]] %s1262_s9  ;;  %p1085_p11 = pnand %p591_p8, %p191_p10 }
  0x1c   : > { %s1264_s10 = scalar_select %p1077_p9, 1, 0 }
  0x1d   : > { %p631_p12 = pneg %p1085_p11  ;;  %s34_s15 = sadd.s32 1, %s956_s26 }
  0x1e   : > { %1265 = sst [smem:[#allocation21_spill]] %s1264_s10  ;;  %s966_s16 = smov [#allocation4]  }
  0x1f   : > { %p632_p13 = pnand %p631_p12, %p1057_p1  ;;  %p35_p0 = scmp.ge.s32.totalorder %s34_s15, 2 }
  0x20   : > { %s203_s13 = sshll.u32 %s1266_s0, 4  ;;  %s37_s17 = sadd.s32 1, %s960_s27  ;;  %s204_s13 = int_to_ptr.vmem [resolvable:$true] %s203_s13 }
  0x21   : > { %634 = dma.vmem_to_smem (!%p632_p13), %s204_s13, 16, %s966_s16, [#allocation7]  }
  0x22   : > { %s587_s21 = sshll.u32 %s960_s27, 1  ;;  %s111_s29 = sadd.s32 1, %s944_s23 }
  0x23   : > { %s1296_s15 = smov (%p35_p0, %s34_s15), 0  ;;  %s1298_s17 = smov (!%p35_p0, %s37_s17), %s960_s27 }
  0x24   : > { %s105_s30 = sadd.s32 %s956_s26, %s587_s21  ;;  %p118_p2 = scmp.ne.s32.totalorder %s944_s23, %s940_s22 }
  0x25   : > { %p39_p4 = scmp.ge.s32.totalorder %s1298_s17, 2  ;;  %p119_p5 = scmp.eq.s32.totalorder %s964_s28, 0 }
  0x26   : > { %p647_p6 = scmp.lt.s32.totalorder %s964_s28, 4  ;;  %s1106_s11 = sand.u32 1, %s944_s23  }
  0x27   : > { %s1300_s17 = smov (%p39_p4, %s1298_s17), 0  ;;  %p1110_p8 = por %p119_p5, %p118_p2 }
  0x28   : > { %1268 = sst [smem:[#allocation22_spill]] %s1300_s17  ;;  %s588_s13 = sshll.u32 %s1300_s17, 1 }
  0x29   : > { %s164_s16 = ssub.s32 %s960_s27, %s1300_s17  ;;  %s107_s21 = sadd.s32 %s588_s13, %s1296_s15 }
  0x2a   : > { %p165_p10 = scmp.eq.s32.totalorder %s164_s16, 0  ;;  %s108_s7 = ssub.s32 %s105_s30, %s107_s21 }
  0x2b   : > { %s594_s0 = sshll.u32 %s1106_s11, 3  ;;  %p109_p12 = scmp.eq.s32.totalorder %s108_s7, 0 }
  0x2c   : > { %s1270_s26 = sadd.s32 1, %s932_s20  ;;  %s596_s5 = sshll.u32 %s105_s30, 3 }
  0x2d   : > { %s1122_s10 = scalar_select %p165_p10, %s932_s20, %s1270_s26  }
  0x2e   : > { %s1125_s18 = scalar_select %p109_p12, %s944_s23, %s111_s29  }
  0x2f   : > { %s224_s9 = scalar_lea.vmem [#allocation8], %s594_s0  ;;  %s230_s24 = scalar_lea.hbm %s1240_s3, %s596_s5 }
  0x30   : > { %s234_s2 = sshll.u32 %s224_s9, 4  ;;  %s232_s17 = sshll.u32 %s230_s24, 4  ;;  %s235_s2 = int_to_ptr.vmem [resolvable:$true] %s234_s2  ;;  %s233_s17 = int_to_ptr.hbm [resolvable:$true] %s232_s17 }
  0x31   : > { %p636_p13 = pnand %p647_p6, %p1110_p8  ;;  %s221_s7 = scalar_lea.sflag [#allocation5], %s1106_s11 }
  0x32   : > { %s251_s29 = scalar_lea.hbm %s1241_s4, %s596_s5  ;;  %s245_s30 = scalar_lea.vmem [#allocation9], %s594_s0 }
  0x33   : > { %638 = dma.hbm_to_vmem [thread:$0]  (!%p636_p13), %s233_s17, 128, %s235_s2, %s221_s7  }
  0x34   : > { %s255_s16 = sshll.u32 %s245_s30, 4  ;;  %s253_s21 = sshll.u32 %s251_s29, 4  ;;  %s256_s16 = int_to_ptr.vmem [resolvable:$true] %s255_s16  ;;  %s254_s21 = int_to_ptr.hbm [resolvable:$true] %s253_s21 }
  0x35   : > { %s242_s9 = scalar_lea.sflag [#allocation10], %s1106_s11  ;;  %264 = sbr.rel (%p1085_p11) target bundleno = 820 (0x334), region = 40 }
  0x36   : > { %641 = dma.hbm_to_vmem [thread:$0]  (!%p636_p13), %s254_s21, 128, %s256_s16, %s242_s9  }
  0x3a   : > { %907 = dma.done.wait (%p1057_p1), [#allocation7], 16  }
  0x3b   : > { %909 = vsyncadd (%p1057_p1), [#allocation7], 4294967280  ;;  %s271_s1 = sand.u32 1, %s940_s22  }
  0x3c   : > { %s602_s2 = sshll.u32 %s271_s1, 3  ;;  %s272_s0 = scalar_lea.sflag [#allocation5], %s271_s1 }
  0x3d   : > { %s1146_s5 = scalar_lea.vmem [#allocation8], %s602_s2 }
  0x3e   : > { %911 = dma.done.wait (%p1066_p3), %s272_s0, 128  }
  0x3f   : > { %913 = vsyncadd (%p1066_p3), %s272_s0, 4294967168  ;;  %s282_s24 = scalar_lea.sflag [#allocation10], %s271_s1  ;;  %s1152_s25 = scalar_lea.vmem [#allocation9], %s602_s2 }
  0x40   : > { %915 = dma.done.wait (%p1066_p3), %s282_s24, 128  }
  0x41   : > { %917 = vsyncadd (%p1066_p3), %s282_s24, 4294967168 }
  0x42   : > { %291 = sfence }
  0x43   : > { %s1271_s6 = sld [smem:[#allocation17_spill]]  ;;  %s1251_s14 = sand.u32 1, %s928_s19  }
  0x44   : > { %s1162_s17 = sshll.u32 %s1251_s14, 3 }
  0x45   : > { %s318_s11 = scalar_lea.vmem [#allocation11], %s1162_s17 }
  0x49   : > { %p323_p1 = scmp.eq.s32.totalorder %s1271_s6, 0  ;;  %p605_p11 = scmp.ne.s32.totalorder %s1271_s6, 0 }
  0x4a   : > { %s967_s12 = smov (!%p605_p11), 0.0  }
  0x4b   : > { %326 = sbr.rel (%p605_p11) target bundleno = 82 (0x52), region = 56  ;;  %328 = sst [smem:[#allocation2]] (!%p605_p11), %s967_s12 }
  0x50   : > { %v968_v0 = vmov 0.0  }
  0x51   : > { %329 = vst [vmem:[#allocation3] sm:$0x1] %v968_v0 }
  0x52 PF: > { %s1272_s8 = sld [smem:[#allocation18_spill]] }
  0x58   : > { %p330_p3 = scmp.eq.s32.totalorder %s1272_s8, 0 }
  0x5a   : > { %p331_p0 = pnand %p330_p3, %p323_p1 }
  0x5b   : > { %s1273_s13 = sld [smem:[#allocation24_spill]] (!%p331_p0) }
  0x5c   : > { %334 = sbr.rel (%p331_p0) target bundleno = 539 (0x21b), region = 60  ;;  %s1274_s16 = sld [smem:[#allocation25_spill]] (!%p331_p0) }
  0x61   : > { %v335_v1 = vld [vmem:[%s1273_s13] sm:$0xff]  ;;  %vm336_vm0 = vcmask 80896   ;;  %v969_v4 = vmov 0   ;;  %v349_v11 = vlaneseq  ;;  %v970_v19 = vmov 8.0  }
  0x62   : > { %v337_v2 = vsel %vm336_vm0, %v335_v1, -inf  ;;  %v351_v3 = vld [vmem:[%s1274_s16] sm:$0xff]  ;;  %743 = vset.pattern.permute.xlu1 %v969_v4  ;;  %744 = vset.pattern.permute.xlu0 %v969_v4 }
  0x63   : > { %338 = vmax.xlane.f32.xlu0 %v337_v2  ;;  %353 = vperm.xlu1 %743, %v351_v3   ;;  %v350_v12 = vand.u32 127, %v349_v11 }
  0xd5   : > { %v354_v13 = vpop.permute.xlu1 %353 }
  0xd6   : > { %v339_v5 = vpop.xlane.xlu0 %338  ;;  %vm355_vm1 = vcmp.eq.s32.totalorder %v350_v12, %v354_v13 }
  0xd7   : > { %v340_v6 = vsub.f32 %v335_v1, %v339_v5 }
  0xd9   : > { %v341_v7 = vmul.f32 1.442695, %v340_v6 }
  0xdb   : > { %745 = vpow2.f32 %v341_v7 }
  0xe1   : > { %v746_v8 = vpop.eup %745 }
  0xe2   : > { %v343_v9 = vsel %vm336_vm0, %v746_v8, 0.0 }
  0xe3   : > { %344 = vadd.xlane.f32.xlu0 %v343_v9 }
 0x156   : > { %v345_v10 = vpop.xlane.xlu0 %344 }
 0x157   : > { %747 = vlog2.f32 %v345_v10 }
 0x158   : > { %749 = vrcp.f32 %v970_v19 }
 0x15d   : > { %v748_v14 = vpop.eup %747 }
 0x15e   : > { %v347_v15 = vmul.f32 0.6931472, %v748_v14  ;;  %v750_v20 = vpop.eup %749 }
 0x15f   : > { %v369_v21 = vmul.f32 8.0, %v750_v20  ;;  %vm373_vm2 = vweird.f32 %v750_v20 }
 0x160   : > { %v348_v16 = vsub.f32 %v340_v6, %v347_v15 }
 0x161   : > { %v370_v22 = vsub.f32 1.0, %v369_v21 }
 0x162   : > { %v356_v17 = vsel %vm355_vm1, %v348_v16, 0.0 }
 0x163   : > { %v357_v18 = vsel %vm336_vm0, %v356_v17, 0.0  ;;  %v371_v26 = vmul.f32 %v750_v20, %v370_v22 }
 0x164   : > { %358 = vadd.xlane.f32.xlu1 %v357_v18 }
 0x165   : > { %v372_v29 = vadd.f32 %v750_v20, %v371_v26 }
 0x167   : > { %v374_v32 = vsel %vm373_vm2, %v750_v20, %v372_v29 }
 0x1d7   : > { %v359_v23 = vpop.xlane.xlu1 %358 }
 0x1d8   : > { %v360_v24 = vrot.slane %v359_v23, 4 }
 0x1da   : > { %v361_v25 = vadd.f32 %v360_v24, %v359_v23 }
 0x1dc   : > { %v362_v27 = vrot.slane %v361_v25, 2 }
 0x1de   : > { %v363_v28 = vadd.f32 %v362_v27, %v361_v25 }
 0x1e0   : > { %v364_v30 = vrot.slane %v363_v28, 1 }
 0x1e2   : > { %v365_v31 = vadd.f32 %v364_v30, %v363_v28 }
 0x1e4   : > { %615 = vpush %v365_v31 }
 0x1e5   : > { %617 = vpush %v374_v32 }
 0x215   : > { %s616_s21 = spop %615 }
 0x216   : > { %s367_s9 = ssub.f32 0.0, %s616_s21  ;;  %s618_s1 = spop %617 }
 0x218   : > { %s376_s2 = smul.f32 %s618_s1, %s367_s9 }
 0x21a   : > { %378 = sst [smem:[#allocation2]] %s376_s2 }
 0x21b PF: > { %v379_v33 = vld [vmem:[%s1146_s5] sm:$0xff]  ;;  %v380_v37 = vld [vmem:[%s1152_s25] sm:$0xff]  ;;  %s1275_s0 = sld [smem:[#allocation17_spill]] }
 0x21c   : > { %v381_v34 = vand.u32 2147483647, %v379_v33  ;;  %v411_v4 = vld [vmem:[#allocation3] sm:$0x1] }
 0x21e   : > { %v382_v35 = vadd.f32 1e-16, %v381_v34 }
 0x220   : > { %751 = vlog2.f32 %v382_v35 }
 0x221   : > { %p608_p2 = scmp.ne.s32.totalorder %s1275_s0, 1 }
 0x222   : > { %s1276_s5 = sld [smem:[#allocation18_spill]] (!%p608_p2) }
 0x223   : > { %s609_s24 = sld [smem:[#allocation4 + $0x2]] (!%p608_p2) }
 0x224   : > { %s441_s25 = sld [smem:[#allocation2]] (!%p608_p2) }
 0x225   : > { %s442_s6 = sld [smem:[#allocation4]] (!%p608_p2) }
 0x226   : > { %v752_v36 = vpop.eup %751  ;;  %s610_s12 = sld [smem:[#allocation4 + $0x1]] (!%p608_p2) }
 0x227   : > { %v384_v38 = vmul.f32 0.6931472, %v752_v36 }
 0x228   : > { %p437_p4 = scmp.eq.s32.totalorder (!%p608_p2), %s1276_s5, 1 }
 0x229   : > { %v385_v39 = vsub.f32 %v380_v37, %v384_v38 }
 0x22b   : > { %v386_v40 = vmul.f32 2.0, %v385_v39  ;;  %s443_s13 = smul.f32 (!%p608_p2), %s442_s6, %s441_s25 }
 0x22d   : > { %v606_v41 = vclamps-f32 %v386_v40, 10.0 }
 0x22f   : > { %v389_v42 = vmul.f32 1.48695, %v606_v41  ;;  %v396_v43 = vsub.f32 0.0, %v606_v41 }
 0x231   : > { %v390_v44 = vadd.f32 1.8732, %v389_v42  ;;  %v397_v45 = vmul.f32 1.442695, %v396_v43 }
 0x233   : > { %v391_v46 = vmul.f32 0.5, %v390_v44  ;;  %753 = vpow2.f32 %v397_v45 }
 0x235   : > { %755 = vtanh.f32 %v391_v46 }
 0x239   : > { %v754_v47 = vpop.eup %753 }
 0x23a   : > { %v399_v48 = vadd.f32 1.0, %v754_v47  ;;  %v402_v49 = vmul.f32 -0.5, %v754_v47  ;;  %v405_v53 = vand.u32 2147483647, %v754_v47 }
 0x23b   : > { %v756_v50 = vpop.eup %755 }
 0x23c   : > { %v393_v51 = vmul.f32 0.5, %v756_v50  ;;  %757 = vlog2.f32 %v399_v48  ;;  %v403_v52 = vadd.f32 1.0, %v402_v49  ;;  %vm406_vm3 = vcmp.lt.f32.partialorder %v405_v53, 0.0004427343 }
 0x23e   : > { %v394_v54 = vadd.f32 0.5, %v393_v51  ;;  %v404_v55 = vmul.f32 %v754_v47, %v403_v52 }
 0x240   : > { %v395_v58 = vmul.f32 0.63576, %v394_v54 }
 0x242   : > { %v758_v56 = vpop.eup %757 }
 0x243   : > { %v401_v57 = vmul.f32 0.6931472, %v758_v56 }
 0x245   : > { %v407_v59 = vsel %vm406_vm3, %v404_v55, %v401_v57 }
 0x246   : > { %v408_v60 = vmul.f32 0.5, %v407_v59 }
 0x248   : > { %v409_v61 = vsub.f32 %v395_v58, %v408_v60 }
 0x24a   : > { %v607_v62 = vadd.f32 -0.63576, %v409_v61 }
 0x24c   : > { %v412_v63 = vrot.slane %v607_v62, 4 }
 0x24e   : > { %v413_v0 = vadd.f32 %v607_v62, %v412_v63 }
 0x250   : > { %v414_v1 = vrot.slane %v413_v0, 2 }
 0x252   : > { %v415_v2 = vadd.f32 %v414_v1, %v413_v0 }
 0x254   : > { %v416_v3 = vrot.slane %v415_v2, 1 }
 0x256   : > { %v417_v5 = vadd.f32 %v416_v3, %v415_v2  ;;  %423 = sbr.rel (%p608_p2) target bundleno = 799 (0x31f), region = 64 }
 0x258   : > { %v418_v6 = vadd.f32 %v417_v5, %v411_v4 }
 0x25a   : > { %419 = vst [vmem:[#allocation3] sm:$0x1] %v418_v6 }
 0x25b   : > { %vm425_vm4 = vcmask 1040384   ;;  %s1302_s24 = smov (!%p437_p4, %s609_s24), 0.0 }
 0x261   : > { %v424_v7 = vld [vmem:[#allocation3] sm:$0x1] }
 0x262   : > { %v426_v8 = vsel %vm425_vm4, %v424_v7, 0.0 }
 0x263   : > { %427 = vadd.xlane.f32.xlu0 %v426_v8 }
 0x2d6   : > { %v428_v9 = vpop.xlane.xlu0 %427 }
 0x2d7   : > { %v429_v10 = vrot.slane %v428_v9, 4 }
 0x2d9   : > { %v430_v11 = vadd.f32 %v429_v10, %v428_v9 }
 0x2db   : > { %v431_v12 = vrot.slane %v430_v11, 2 }
 0x2dd   : > { %v432_v13 = vadd.f32 %v431_v12, %v430_v11 }
 0x2df   : > { %v433_v14 = vrot.slane %v432_v13, 1 }
 0x2e1   : > { %v434_v15 = vadd.f32 %v433_v14, %v432_v13 }
 0x2e3   : > { %619 = vpush %v434_v15 }
 0x314   : > { %s620_s8 = spop %619 }
 0x315   : > { %s436_s7 = ssub.f32 0.0, %s620_s8 }
 0x317   : > { %s440_s26 = sadd.f32 %s1302_s24, %s436_s7 }
 0x319   : > { %s445_s29 = smul.f32 %s610_s12, %s440_s26 }
 0x31b   : > { %s446_s30 = sadd.f32 %s445_s29, %s443_s13 }
 0x31d   : > { %v447_v16 = vstv %s446_s30 }
 0x31e   : > { %448 = vst [vmem:[%s318_s11] sm:$0xff] %v447_v16 }
 0x31f PF: > { %s1277_s16 = sld [smem:[#allocation18_spill]]  ;;  %s462_s14 = sshll.u32 %s318_s11, 4  ;;  %s463_s14 = int_to_ptr.vmem [resolvable:$true] %s462_s14 }
 0x320   : > { %s1279_s0 = sld [smem:[#allocation26_spill]]  ;;  %s1280_s25 = sand.u32 1, %s928_s19  }
 0x321   : > { %s450_s6 = scalar_lea.sflag [#allocation6], %s1280_s25 }
 0x325   : > { %s612_s9 = sshll.u32 %s1277_s16, 3 }
 0x326   : > { %s460_s5 = scalar_lea.hbm %s1279_s0, %s612_s9  ;;  %s854_s13 = scalar_lea.hbm %s1279_s0, 16 }
 0x327   : > { %s464_s24 = sshll.u32 %s460_s5, 4  ;;  %s465_s24 = int_to_ptr.hbm [resolvable:$true] %s464_s24 }
 0x328   : > { %s848_s12 = sshra.s32 %s465_s24, 4  ;;  %s849_s12 = int_to_ptr.hbm [resolvable:$true] %s848_s12 }
 0x329   : > { %s850_s8 = scalar_lea.hbm %s849_s12, 8  ;;  %p855_p10 = scmp.lt.s32.totalorder %s849_s12, %s1279_s0 }
 0x32a   : > { %p851_p5 = scmp.ne.s32.totalorder %s849_s12, %s850_s8  ;;  %p856_p12 = scmp.lt.s32.totalorder %s854_s13, %s850_s8 }
 0x32c   : > { %p852_p6 = pnand %p851_p5, %p1072_p7  ;;  %p857_p13 = por %p856_p12, %p855_p10 }
 0x32e   : > { %p853_p8 = pneg %p852_p6 }
 0x330   : > { %p858_p1 = pnand %p857_p13, %p853_p8 }
 0x332   : > { %861 = shalt.err (!%p858_p1)
}
 0x333   : > { %629 = dma.vmem_to_hbm [thread:$0]  (%p1072_p7), %s463_s14, 128, %s465_s24, %s450_s6  }
 0x334 PF: > { %s1281_s17 = sld [smem:[#allocation16_spill]]  ;;  %p649_p11 = scmp.ge.s32.totalorder %s964_s28, 2 }
 0x336   : > { %p643_p3 = pnand %p649_p11, %p1077_p9 }
 0x338   : > { %p644_p0 = pneg %p643_p3 }
 0x33a   : > { %s476_s16 = sand.u32 1, %s1281_s17  }
 0x33b   : > { %s477_s9 = scalar_lea.sflag [#allocation6], %s476_s16 }
 0x33c   : > { %919 = dma.done.wait (%p644_p0), %s477_s9, 128  }
 0x33d   : > { %921 = vsyncadd (%p644_p0), %s477_s9, 4294967168  ;;  %s25_s28 = sadd.s32 1, %s964_s28   ;;  %s1283_s14 = smov %s1125_s18 }
 0x33e   : > { %p22_p2 = scmp.ge.s32.totalorder %s25_s28, 6   ;;  %s1284_s24 = sld [smem:[#allocation19_spill]] }
 0x33f   : > { %s1285_s1 = sld [smem:[#allocation22_spill]]  ;;  %s1286_s18 = smov %s928_s19 }
 0x340   : > { %s1287_s19 = smov %s932_s20  ;;  %s1288_s20 = smov %s1122_s10 }
 0x341   : > { %s1289_s21 = smov %s940_s22  ;;  %s1290_s22 = smov %s944_s23 }
 0x342   : > { %s1291_s23 = smov %s1283_s14  ;;  %s1292_s25 = smov %s960_s27 }
 0x343   : > { %s1293_s26 = smov %s1296_s15  ;;  %24 = sbr.rel (!%p22_p2) target bundleno = 17 (0x11), region = 117 }
 0x345   : > { %s1294_s27 = smov %s1285_s1 }
 0x348   :  { %483 = vsyncpa [#allocation5], 1 }
 0x349   :  { %485 = vsyncpa [#allocation5 + $0x1], 1 }
 0x34a   :  { %486 = vsyncpa [#allocation10], 1 }
 0x34b   :  { %488 = vsyncpa [#allocation10 + $0x1], 1 }
 0x34c   :  { %489 = vsyncpa [#allocation6], 1 }
 0x34d   :  { %491 = vsyncpa [#allocation6 + $0x1], 1 }
 0x34e   :  { %492 = vsyncpa [#allocation7], 1 }
 0x34f   :  { %494 = vsyncpa [#allocation7 + $0x1], 1 }

</bundles_post_ra>
